<compile_context>
chip_gen: v7x
topology: tpu7x:2x2x1
jax: 0.10.0
libtpu: 0.0.40
codegen_flags: <defaults>
</compile_context>

<pallas_src>
import functools

import jax
import jax.numpy as jnp
from jax.experimental import pallas as pl
from jax.experimental.pallas import tpu as pltpu

_LANE = 128                            # row width; row-blocks are HBM-contiguous
_TARGET_TILE_BYTES = 4 * 1024 * 1024   # ~4 MiB per input tile (per buffer)
_VMEM_LIMIT_BYTES = 40 * 1024 * 1024   # v5e default scoped limit is only 16 MiB


def _round_up(x, m):
    return ((x + m - 1) // m) * m


def _pick_block_rows(total_rows, itemsize, override=None):
    """Dtype-aware block rows: ~4 MiB tiles, multiple of 8, capped to the input."""
    if override is not None:
        return max(8, _round_up(int(override), 8))
    target = max(8, (_TARGET_TILE_BYTES // (_LANE * itemsize)) // 8 * 8)
    return min(target, _round_up(total_rows, 8))


def _l1_reduce_kernel(x_ref, y_ref, o_ref, acc_ref, *, inv_n, valid_rows,
                      block_rows, kpb, needs_mask):
    """Streaming |x-y| reduction with a tiny (8,128) accumulator per split."""
    s = pl.program_id(0)   # split axis ("parallel": sharded across TCs on v7x)
    k = pl.program_id(1)   # reduction axis ("arbitrary")

    @pl.when(k == 0)
    def _():
        acc_ref[...] = jnp.zeros_like(acc_ref)

    x = x_ref[...].astype(jnp.float32)
    y = y_ref[...].astype(jnp.float32)
    d = jnp.abs(x - y)

    if needs_mask:
        # Zero rows beyond the valid range: covers the partial last block and
        # the (clamped) redundant block of an odd 2-way split.  Mask uses the
        # *unclamped* block index so redundant data is never double counted.
        start = (s * kpb + k) * block_rows
        row = jax.lax.broadcasted_iota(jnp.int32, (block_rows, 1), 0) + start
        d = jnp.where(row < valid_rows, d, 0.0)

    # Layout-preserving partial reduce (minor dims stay (8,128)): pure vreg
    # adds into a 4 KiB accumulator -- no full-tile acc load/store per step.
    acc_ref[...] += jnp.sum(d.reshape(block_rows // 8, 8, _LANE), axis=0)

    @pl.when(k == kpb - 1)
    def _():
        total = jnp.sum(acc_ref[...]) * inv_n   # single XLU reduce per split
        o_ref[...] = jnp.full(o_ref.shape, total, jnp.float32)


def _l1_elementwise_kernel(x_ref, y_ref, o_ref):
    x = x_ref[...].astype(jnp.float32)
    y = y_ref[...].astype(jnp.float32)
    o_ref[...] = jnp.abs(x - y).astype(o_ref.dtype)


def l1_loss(x, y, size_average=True, reduce=True, *, block_rows=None):
    """Pallas TPU implementation matching torch.nn.L1Loss forward semantics."""
    # TODO(synk): _assert_no_grad / autograd flags have no meaning in a
    # forward-only JAX kernel; the target.float() promotion is done in-kernel.
    assert x.shape == y.shape, "input and target must have the same shape"
    orig_shape = x.shape
    n = int(x.size)
    in_itemsize = max(jnp.dtype(x.dtype).itemsize, jnp.dtype(y.dtype).itemsize)
    # Module spec does `target = target.float()`, so the result dtype is
    # promote(input_dtype, float32) (f32 for f32/bf16/f16 inputs).
    out_dtype = jnp.promote_types(x.dtype, jnp.float32)

    xf = x.reshape(-1)
    yf = y.reshape(-1)
    if n % _LANE != 0:
        # TODO(synk): n not divisible by 128 has no free lane-aligned 2-D view;
        # pay one pad pass to the next multiple of 128.  Padded elements are
        # zero (|0-0| = 0) and also row-masked, and inv_n uses the original n.
        pad = _round_up(n, _LANE) - n
        xf = jnp.pad(xf, (0, pad))
        yf = jnp.pad(yf, (0, pad))
        padded = True
    else:
        padded = False
    rows = xf.size // _LANE
    xf = xf.reshape(rows, _LANE)
    yf = yf.reshape(rows, _LANE)

    if reduce:
        brows = _pick_block_rows(rows, in_itemsize, block_rows)
        kb = pl.cdiv(rows, brows)                 # number of row blocks
        num_splits = 2 if kb >= 2 else 1          # 2-way split for v7x megacore
        kpb = -(-kb // num_splits)                # blocks per split
        needs_mask = (num_splits * kpb * brows) != rows
        inv_n = (1.0 / float(n)) if size_average else 1.0
        last_block = kb - 1

        def in_index(s, k):
            # Clamp so the DMA window always stays in bounds (odd kb + split
            # yields one redundant block, zeroed by the row mask).
            return (jnp.minimum(s * kpb + k, last_block), 0)

        in_spec = pl.BlockSpec((brows, _LANE), in_index)

        out = pl.pallas_call(
            functools.partial(_l1_reduce_kernel, inv_n=inv_n, valid_rows=rows,
                              block_rows=brows, kpb=kpb, needs_mask=needs_mask),
            out_shape=jax.ShapeDtypeStruct((num_splits, 8, _LANE), jnp.float32),
            grid_spec=pltpu.PrefetchScalarGridSpec(
                num_scalar_prefetch=0,
                grid=(num_splits, kpb),
                in_specs=[in_spec, in_spec],
                out_specs=pl.BlockSpec((1, 8, _LANE), lambda s, k: (s, 0, 0)),
                scratch_shapes=[pltpu.VMEM((8, _LANE), jnp.float32)],
            ),
            compiler_params=pltpu.CompilerParams(
                dimension_semantics=("parallel", "arbitrary"),
                vmem_limit_bytes=_VMEM_LIMIT_BYTES),
        )(xf, yf)
        # One tiny, already-scaled partial per split; sum them (<= 2 elements).
        return jnp.sum(out[:, 0, 0]).astype(out_dtype)
    else:
        brows = _pick_block_rows(
            rows, max(in_itemsize, jnp.dtype(out_dtype).itemsize), block_rows)
        kb = pl.cdiv(rows, brows)
        tile = pl.BlockSpec((brows, _LANE), lambda i: (i, 0))

        out = pl.pallas_call(
            _l1_elementwise_kernel,
            out_shape=jax.ShapeDtypeStruct((rows, _LANE), out_dtype),
            grid_spec=pltpu.PrefetchScalarGridSpec(
                num_scalar_prefetch=0,
                grid=(kb,),
                in_specs=[tile, tile],
                out_specs=tile,   # lane-dense (128-wide) unmasked stores
            ),
            compiler_params=pltpu.CompilerParams(
                dimension_semantics=("parallel",),
                vmem_limit_bytes=_VMEM_LIMIT_BYTES),
        )(xf, yf)
        if padded:
            return out.reshape(-1)[:n].reshape(orig_shape)
        return out.reshape(orig_shape)   # free reshape, no slice copy


if __name__ == "__main__":
    key = jax.random.PRNGKey(0)
    kx, ky = jax.random.split(key)
    # Small NCHW-style input consistent with an arbitrary-shape loss.
    x = jax.random.normal(kx, (2, 4, 16, 16), dtype=jnp.float32)
    y = jax.random.normal(ky, (2, 4, 16, 16), dtype=jnp.float32)

    # Default module config: size_average=True, reduce=True -> scalar mean |x-y|
    loss = jax.block_until_ready(l1_loss(x, y, size_average=True, reduce=True))
    ref = jnp.mean(jnp.abs(x - y))
    assert jnp.allclose(loss, ref, rtol=1e-6, atol=1e-6), (loss, ref)

    # size_average=False -> sum
    loss_sum = jax.block_until_ready(l1_loss(x, y, size_average=False))
    assert jnp.allclose(loss_sum, jnp.sum(jnp.abs(x - y)), rtol=1e-5, atol=1e-5)

    # reduce=False -> elementwise |x - y|, original shape
    loss_none = jax.block_until_ready(l1_loss(x, y, reduce=False))
    assert loss_none.shape == x.shape
    assert jnp.allclose(loss_none, jnp.abs(x - y), rtol=1e-6, atol=1e-6)

    # Exercise the 2-way split + clamped redundant block + row masking with a
    # small block_rows override (48 rows -> 3 blocks -> 2 splits of 2 blocks).
    xb = jax.random.normal(kx, (48, 128), dtype=jnp.bfloat16)
    yb = jax.random.normal(ky, (48, 128), dtype=jnp.bfloat16)
    loss_b = jax.block_until_ready(l1_loss(xb, yb, block_rows=16))
    ref_b = jnp.mean(jnp.abs(xb.astype(jnp.float32) - yb.astype(jnp.float32)))
    assert jnp.allclose(loss_b, ref_b, rtol=1e-5, atol=1e-5), (loss_b, ref_b)

    # Non-multiple-of-128 element count -> padded-tail path.
    xo = jax.random.normal(kx, (3, 5), dtype=jnp.float32)
    yo = jax.random.normal(ky, (3, 5), dtype=jnp.float32)
    loss_o = jax.block_until_ready(l1_loss(xo, yo))
    assert jnp.allclose(loss_o, jnp.mean(jnp.abs(xo - yo)), rtol=1e-6, atol=1e-6)

    print("KERNEL_OK")
</pallas_src>

<mosaic_0001>
module attributes {stable_mosaic.version = 11 : i64} {
  func.func @_l1_reduce_kernel(%arg0: i32, %arg1: i32, %arg2: memref<16x128xf32, #tpu.memory_space<vmem>>, %arg3: memref<16x128xf32, #tpu.memory_space<vmem>>, %arg4: memref<1x8x128xf32, #tpu.memory_space<vmem>>, %arg5: memref<8x128xf32, #tpu.memory_space<vmem>>) attributes {dimension_semantics = [#tpu.dimension_semantics<parallel>, #tpu.dimension_semantics<arbitrary>], iteration_bounds = array<i64: 1, 1>, scalar_prefetch = 0 : i64, scratch_operands = 1 : i64, tpu.core_type = #tpu.core_type<tc>, window_params = [{transform_indices = @transform_0, window_bounds = array<i64: 16, 128>}, {transform_indices = @transform_1, window_bounds = array<i64: 16, 128>}, {transform_indices = @transform_2, window_bounds = array<i64: 1, 8, 128>}]} {
    %c0_i32 = arith.constant 0 : i32
    %0 = arith.cmpi eq, %arg1, %c0_i32 : i32
    %1 = arith.extui %0 : i1 to i32
    %c0_i32_0 = arith.constant 0 : i32
    %2 = arith.cmpi ne, %1, %c0_i32_0 : i32
    scf.if %2 {
      %cst_10 = arith.constant 0.000000e+00 : f32
      %15 = vector.broadcast %cst_10 : f32 to vector<8x128xf32>
      %c0_11 = arith.constant 0 : index
      %c0_12 = arith.constant 0 : index
      %16 = vector.load %arg5[%c0_11, %c0_12] : memref<8x128xf32, #tpu.memory_space<vmem>>, vector<8x128xf32>
      tpu.vector_store %arg5[%c0_11, %c0_12], %15 {strides = array<i32>} : memref<8x128xf32, #tpu.memory_space<vmem>>, vector<8x128xf32>,
    } else {
    }
    %c0 = arith.constant 0 : index
    %c0_1 = arith.constant 0 : index
    %3 = vector.load %arg2[%c0, %c0_1] : memref<16x128xf32, #tpu.memory_space<vmem>>, vector<16x128xf32>
    %c0_2 = arith.constant 0 : index
    %c0_3 = arith.constant 0 : index
    %4 = vector.load %arg3[%c0_2, %c0_3] : memref<16x128xf32, #tpu.memory_space<vmem>>, vector<16x128xf32>
    %5 = arith.subf %3, %4 : vector<16x128xf32>
    %6 = math.absf %5 : vector<16x128xf32>
    %c0_4 = arith.constant 0 : index
    %c0_5 = arith.constant 0 : index
    %7 = vector.load %arg5[%c0_4, %c0_5] : memref<8x128xf32, #tpu.memory_space<vmem>>, vector<8x128xf32>
    %8 = vector.shape_cast %6 : vector<16x128xf32> to vector<2x8x128xf32>
    %cst = arith.constant dense<0.000000e+00> : vector<8x128xf32>
    %9 = vector.multi_reduction <add>, %8, %cst [0] : vector<2x8x128xf32> to vector<8x128xf32>
    %10 = arith.addf %7, %9 : vector<8x128xf32>
    %c0_6 = arith.constant 0 : index
    %c0_7 = arith.constant 0 : index
    %11 = vector.load %arg5[%c0_6, %c0_7] : memref<8x128xf32, #tpu.memory_space<vmem>>, vector<8x128xf32>
    tpu.vector_store %arg5[%c0_6, %c0_7], %10 {strides = array<i32>} : memref<8x128xf32, #tpu.memory_space<vmem>>, vector<8x128xf32>,
    %c0_i32_8 = arith.constant 0 : i32
    %12 = arith.cmpi eq, %arg1, %c0_i32_8 : i32
    %13 = arith.extui %12 : i1 to i32
    %c0_i32_9 = arith.constant 0 : i32
    %14 = arith.cmpi ne, %13, %c0_i32_9 : i32
    scf.if %14 {
      %c0_10 = arith.constant 0 : index
      %c0_11 = arith.constant 0 : index
      %15 = vector.load %arg5[%c0_10, %c0_11] : memref<8x128xf32, #tpu.memory_space<vmem>>, vector<8x128xf32>
      %16 = vector.shape_cast %15 : vector<8x128xf32> to vector<1x8x128xf32>
      %cst_12 = arith.constant dense<0.000000e+00> : vector<1xf32>
      %17 = vector.multi_reduction <add>, %16, %cst_12 [1, 2] : vector<1x8x128xf32> to vector<1xf32>
      %18 = vector.shape_cast %17 : vector<1xf32> to vector<1x1x1xf32>
      %19 = vector.extract %18[0, 0, 0] : f32 from vector<1x1x1xf32>
      %cst_13 = arith.constant 4.8828125E-4 : f32
      %20 = arith.mulf %19, %cst_13 : f32
      %21 = vector.broadcast %20 : f32 to vector<1x8x128xf32>
      %c0_14 = arith.constant 0 : index
      %c0_15 = arith.constant 0 : index
      %c0_16 = arith.constant 0 : index
      %22 = vector.load %arg4[%c0_14, %c0_15, %c0_16] : memref<1x8x128xf32, #tpu.memory_space<vmem>>, vector<1x8x128xf32>
      tpu.vector_store %arg4[%c0_14, %c0_15, %c0_16], %21 {strides = array<i32>} : memref<1x8x128xf32, #tpu.memory_space<vmem>>, vector<1x8x128xf32>,
    } else {
    }
    return
  }
  func.func @transform_0(%arg0: i32, %arg1: i32) -> (i32, i32) {
    %c1_i32 = arith.constant 1 : i32
    %0 = arith.muli %arg0, %c1_i32 : i32
    %1 = arith.addi %0, %arg1 : i32
    %c0_i32 = arith.constant 0 : i32
    %2 = arith.minsi %1, %c0_i32 : i32
    %c0_i32_0 = arith.constant 0 : i32
    %c0_i32_1 = arith.constant 0 : i32
    return %2, %c0_i32_0 : i32, i32
  }
  func.func @transform_1(%arg0: i32, %arg1: i32) -> (i32, i32) {
    %c1_i32 = arith.constant 1 : i32
    %0 = arith.muli %arg0, %c1_i32 : i32
    %1 = arith.addi %0, %arg1 : i32
    %c0_i32 = arith.constant 0 : i32
    %2 = arith.minsi %1, %c0_i32 : i32
    %c0_i32_0 = arith.constant 0 : i32
    %c0_i32_1 = arith.constant 0 : i32
    return %2, %c0_i32_0 : i32, i32
  }
  func.func @transform_2(%arg0: i32, %arg1: i32) -> (i32, i32, i32) {
    %c0_i32 = arith.constant 0 : i32
    %c0_i32_0 = arith.constant 0 : i32
    %c0_i32_1 = arith.constant 0 : i32
    return %arg0, %c0_i32, %c0_i32_0 : i32, i32, i32
  }
}

</mosaic_0001>

<bundles_post_ra>
// kernel: tpu_custom_call.1
= control target key start
LH: loop header
LB: loop body
LE: loop exit
PB: predicated region body
PF: predicated region fallthrough
CT: control target
= control target key end

     0   :  { %7 = vsyncpa [#allocation4], 0  ;;  %s248_s0 = inlined_call_operand.hbm [shape: f32[16,128], index: 0, kind: input, shape index: {}]   ;;  %s249_s1 = inlined_call_operand.hbm [shape: f32[16,128], index: 1, kind: input, shape index: {}]   ;;  %s250_s2 = inlined_call_operand.hbm [shape: f32[1,8,128], index: 2, kind: output, shape index: {}]  }
   0x1   :  { %8 = vsyncpa [#allocation7], 0 }
   0x2   :  { %9 = vsyncpa [#allocation5], 0  ;;  %s192_s9 = smov [#allocation3]   ;;  %s120_s13 = scalar_lea.hbm %s248_s0, 256 }
   0x3   :  { %s21_s10 = sshll.u32 %s192_s9, 4  ;;  %p121_p0 = scmp.ne.s32.totalorder %s248_s0, %s120_s13  ;;  %s22_s10 = int_to_ptr.vmem [resolvable:$true] %s21_s10 }
   0x4   :  { %p124_p1 = scmp.lt.u32.totalorder %s120_s13, %s248_s0 }
   0x6   :  { %p126_p2 = pnand %p124_p1, %p121_p0 }
   0x8   :  { %129 = shalt.err (!%p126_p2)
}
   0x9   :  { %s130_s18 = scalar_lea.vmem %s22_s10, 256  ;;  %p135_p4 = scmp.lt.s32.totalorder %s22_s10, %s22_s10 }
   0xa   :  { %p131_p3 = scmp.ne.s32.totalorder %s22_s10, %s130_s18  ;;  %p136_p5 = scmp.lt.s32.totalorder %s130_s18, %s130_s18 }
   0xc   :  { %p137_p6 = por %p136_p5, %p135_p4 }
   0xe   :  { %p138_p7 = pnand %p137_p6, %p131_p3 }
  0x10   :  { %141 = shalt.err (!%p138_p7)
}
  0x11   :  { %s193_s19 = smov 128   ;;  %s194_s20 = smov 8  }
  0x12   :  { %27 = dma.hbm_to_vmem [thread:$0]  %s248_s0, 256, %s22_s10, [#allocation4], %s193_s19, %s193_s19, %s194_s20  }
  0x13   :  { %s195_s23 = smov [#allocation6]   ;;  %s142_s27 = scalar_lea.hbm %s249_s1, 256 }
  0x14   :  { %s39_s24 = sshll.u32 %s195_s23, 4  ;;  %p143_p8 = scmp.ne.s32.totalorder %s249_s1, %s142_s27  ;;  %s40_s24 = int_to_ptr.vmem [resolvable:$true] %s39_s24 }
  0x15   :  { %p146_p9 = scmp.lt.u32.totalorder %s142_s27, %s249_s1 }
  0x17   :  { %p148_p10 = pnand %p146_p9, %p143_p8 }
  0x19   :  { %151 = shalt.err (!%p148_p10)
}
  0x1a   :  { %s152_s4 = scalar_lea.vmem %s40_s24, 256  ;;  %p157_p12 = scmp.lt.s32.totalorder %s40_s24, %s40_s24 }
  0x1b   :  { %p153_p11 = scmp.ne.s32.totalorder %s40_s24, %s152_s4  ;;  %p158_p13 = scmp.lt.s32.totalorder %s152_s4, %s152_s4 }
  0x1d   :  { %p159_p0 = por %p158_p13, %p157_p12 }
  0x1f   :  { %p160_p1 = pnand %p159_p0, %p153_p11 }
  0x21   :  { %163 = shalt.err (!%p160_p1)
}
  0x22   :  { %45 = dma.hbm_to_vmem [thread:$0]  %s249_s1, 256, %s40_s24, [#allocation7], %s193_s19, %s193_s19, %s194_s20  }
  0x23   :  { %186 = dma.done.wait [#allocation4], 256  }
  0x24   :  { %187 = vsyncadd [#allocation4], 4294967040 }
  0x25   :  { %188 = dma.done.wait [#allocation7], 256  }
  0x26   :  { %189 = vsyncadd [#allocation7], 4294967040  ;;  %v65_v0 = vld [vmem:[#allocation3] sm:$0xff]  ;;  %v66_v1 = vld [vmem:[#allocation3 + $0x8] sm:$0xff]  ;;  %s196_s1 = smov [#allocation8]  }
  0x27   :  { %v67_v2 = vld [vmem:[#allocation6] sm:$0xff]  ;;  %v68_v3 = vld [vmem:[#allocation6 + $0x8] sm:$0xff]  ;;  %s99_s6 = sshll.u32 %s196_s1, 4  ;;  %s100_s6 = int_to_ptr.vmem [resolvable:$true] %s99_s6 }
  0x28   :  { %v69_v4 = vsub.f32 %v65_v0, %v67_v2  ;;  %v70_v5 = vsub.f32 %v66_v1, %v68_v3  ;;  %s164_s9 = scalar_lea.vmem %s100_s6, 128  ;;  %p169_p3 = scmp.lt.s32.totalorder %s100_s6, %s100_s6 }
  0x29   :  { %p165_p2 = scmp.ne.s32.totalorder %s100_s6, %s164_s9  ;;  %p170_p4 = scmp.lt.s32.totalorder %s164_s9, %s164_s9 }
  0x2a   :  { %v71_v6 = vand.u32 2147483647, %v69_v4  ;;  %v72_v7 = vand.u32 2147483647, %v70_v5 }
  0x2b   :  { %p171_p5 = por %p170_p4, %p169_p3 }
  0x2c   :  { %v74_v8 = vadd.f32 %v72_v7, %v71_v6 }
  0x2d   :  { %p172_p6 = pnand %p171_p5, %p165_p2 }
  0x2e   :  { %81 = vadd.xlane.f32.xlu0 %v74_v8 }
  0xbb   :  { %v82_v9 = vpop.xlane.xlu0 %81 }
  0xbc   :  { %v83_v10 = vrot.slane %v82_v9, 4 }
  0xbe   :  { %v84_v11 = vadd.f32 %v83_v10, %v82_v9 }
  0xc0   :  { %v85_v12 = vrot.slane %v84_v11, 2 }
  0xc2   :  { %v86_v13 = vadd.f32 %v85_v12, %v84_v11 }
  0xc4   :  { %v87_v14 = vrot.slane %v86_v13, 1 }
  0xc6   :  { %v88_v15 = vadd.f32 %v87_v14, %v86_v13 }
  0xc8   :  { %113 = vpush %v88_v15 }
  0xf9   :  { %s114_s7 = spop %113 }
  0xfa   :  { %s90_s8 = smul.f32 0.00048828125, %s114_s7 }
  0xfc   :  { %v91_v16 = vstv %s90_s8 }
  0xfd   :  { %92 = vst [vmem:[#allocation8] sm:$0xff] %v91_v16 }
  0xfe   :  { %175 = shalt.err (!%p172_p6)
}
  0xff   :  { %s176_s12 = scalar_lea.hbm %s250_s2, 128 }
 0x100   :  { %p177_p7 = scmp.ne.s32.totalorder %s250_s2, %s176_s12  ;;  %p180_p8 = scmp.lt.u32.totalorder %s176_s12, %s250_s2 }
 0x102   :  { %p182_p9 = pnand %p180_p8, %p177_p7 }
 0x104   :  { %185 = shalt.err (!%p182_p9)
}
 0x105   :  { %102 = dma.vmem_to_hbm [thread:$0]  %s100_s6, 128, %s250_s2, [#allocation5]  }
 0x106   :  { %190 = dma.done.wait [#allocation5], 128  }
 0x107   :  { %191 = vsyncadd [#allocation5], 4294967168 }
 0x108   :  { %106 = vsyncpa [#allocation4], 1 }
 0x109   :  { %107 = vsyncpa [#allocation7], 1 }
 0x10a   :  { %108 = vsyncpa [#allocation5], 1 }

</bundles_post_ra>
